<compile_context>
chip_gen: v7x
topology: tpu7x:2x2x1
jax: 0.10.0
libtpu: 0.0.40
codegen_flags: <defaults>
</compile_context>

<pallas_src>
import functools

import numpy as np
import jax
import jax.numpy as jnp
from jax.experimental import pallas as pl
from jax.experimental.pallas import tpu as pltpu  # noqa: F401  (TPU backend)


def _round_up(x, m):
    return ((x + m - 1) // m) * m


def _block_layout(pd):
    """Static block indices into the packed (NBLK, R, Npad) parameter slab."""
    return dict(
        WP=0, BP=2,
        W1=3, B1=3 + pd, G1=4 + pd, BE1=5 + pd,
        W2=6 + pd, B2=6 + 2 * pd, G2=7 + 2 * pd, BE2=8 + 2 * pd,
        W3=9 + 2 * pd, B3=9 + 3 * pd, G3=10 + 3 * pd, BE3=11 + 3 * pd,
        NBLK=12 + 3 * pd,
    )


def _dpb_kernel(residual, pd, L, x_ref, p_ref, out_ref):
    """Transposed DynamicPosBias forward.

    x_ref  : (2, Npad)        rows = (dy, dx), lane-dense
    p_ref  : (NBLK, R, Npad)  lane-replicated parameter blocks (_block_layout)
    out_ref: (R, Npad)        rows 0..num_heads-1 valid
    """
    inv_pd = 1.0 / pd
    eps = 1e-5

    def blk(i):
        return p_ref[i]                      # (R, Npad), static first-axis index

    def tree_sum(parts):
        # Pairwise tree -> independent partial accumulators (no serial chain).
        while len(parts) > 1:
            nxt = [parts[i] + parts[i + 1] for i in range(0, len(parts) - 1, 2)]
            if len(parts) & 1:
                nxt.append(parts[-1])
            parts = nxt
        return parts[0]

    def matvec(w0, v, K, b_idx):
        # y[o, n] = sum_k W^T[o, k] * v[k, n] + b[o]
        # Weight columns / bias are lane-replicated -> pure VALU multiplies;
        # only the (1, N) -> (R, N) sublane broadcast of v[k] remains.
        parts = [blk(w0 + k) * v[k:k + 1, :] for k in range(K)]
        parts.append(blk(b_idx))
        return tree_sum(parts)

    def ln_relu(xin, g_idx, be_idx):
        # Feature (sublane) LayerNorm.  Rows >= pd of xin are exactly zero, so
        # sum/pd equals the mean over the live rows.  E[x^2] - mu^2 keeps the
        # two sublane reductions independent.
        s1 = jnp.sum(xin, axis=0, keepdims=True)
        s2 = jnp.sum(xin * xin, axis=0, keepdims=True)
        mu = s1 * inv_pd
        var = jnp.maximum(s2 * inv_pd - mu * mu, 0.0)
        h = (xin - mu) * jax.lax.rsqrt(var + eps)
        # gamma/beta rows >= pd are zero -> dead rows stay exactly zero.
        return jnp.maximum(h * blk(g_idx) + blk(be_idx), 0.0)

    x = x_ref[...]                                              # (2, Npad)

    # pos_proj: Linear(2 -> pos_dim)
    pos = matvec(L["WP"], x, 2, L["BP"])                        # (R, Npad)
    # pos1
    h1 = matvec(L["W1"], ln_relu(pos, L["G1"], L["BE1"]), pd, L["B1"])
    pos = pos + h1 if residual else h1
    # pos2
    h2 = matvec(L["W2"], ln_relu(pos, L["G2"], L["BE2"]), pd, L["B2"])
    pos = pos + h2 if residual else h2
    # pos3: Linear(pos_dim -> num_heads)
    out = matvec(L["W3"], ln_relu(pos, L["G3"], L["BE3"]), pd, L["B3"])

    out_ref[...] = out.astype(out_ref.dtype)


def _pack_params(params, R, n_pad):
    """Build the lane-replicated parameter slab ONCE on the host.

    Each block is (R, n_pad) with the value replicated across all lanes;
    unused rows are exactly zero (so dead sublanes stay zero in the kernel).
    """
    pd = params["wp"].shape[1]
    nh = params["w3"].shape[1]
    L = _block_layout(pd)
    prof = np.zeros((L["NBLK"], R), np.float32)

    def v(a):
        return np.asarray(a, np.float32).reshape(-1)

    wp = np.asarray(params["wp"], np.float32)                   # (2, pd)
    for k in range(2):
        prof[L["WP"] + k, :pd] = wp[k]
    prof[L["BP"], :pd] = v(params["bp"])

    def fill_block(w_key, b_key, g_key, be_key, col0, out_rows):
        w = np.asarray(params[w_key], np.float32)               # (pd, out_rows)
        for k in range(pd):
            prof[col0 + k, :out_rows] = w[k]
        prof[col0 + pd, :out_rows] = v(params[b_key])
        prof[col0 + pd + 1, :pd] = v(params[g_key])
        prof[col0 + pd + 2, :pd] = v(params[be_key])

    fill_block("w1", "b1", "g1", "be1", L["W1"], pd)
    fill_block("w2", "b2", "g2", "be2", L["W2"], pd)
    fill_block("w3", "b3", "g3", "be3", L["W3"], nh)

    prep = np.ascontiguousarray(
        np.broadcast_to(prof[:, :, None], (L["NBLK"], R, n_pad)))
    return jnp.asarray(prep)


def make_dynamic_pos_bias(params, *, residual, n):
    """One-time builder (packing + pallas_call construction hoisted here).

    Returns (forward, table):
      table(biases)   -> (R, n_pad) lane-dense transposed bias table
                         (rows 0..num_heads-1, cols 0..n-1 valid) — the form a
                         downstream attention kernel should consume directly.
      forward(biases) -> (n, num_heads), the torch-interface result.
    """
    pd = params["wp"].shape[1]
    nh = params["w3"].shape[1]
    n_pad = _round_up(max(n, 128), 128)
    R = _round_up(max(pd, nh, 8), 8)
    L = _block_layout(pd)
    nblk = L["NBLK"]

    prep = _pack_params(params, R, n_pad)            # device-resident, built once

    cost = pl.CostEstimate(
        flops=2 * n_pad * (2 * pd + 2 * pd * pd + pd * R),
        transcendentals=3 * n_pad,                   # three rsqrt rows
        bytes_accessed=4 * (2 * n_pad + nblk * R * n_pad + R * n_pad),
    )

    call = pl.pallas_call(
        functools.partial(_dpb_kernel, residual, pd, L),
        grid=(),
        in_specs=[
            pl.BlockSpec((2, n_pad), lambda: (0, 0)),
            pl.BlockSpec((nblk, R, n_pad), lambda: (0, 0, 0)),
        ],
        out_specs=pl.BlockSpec((R, n_pad), lambda: (0, 0)),
        out_shape=jax.ShapeDtypeStruct((R, n_pad), jnp.float32),
        cost_estimate=cost,
    )

    @jax.jit
    def table(biases):
        xt = jnp.zeros((2, n_pad), jnp.float32)
        xt = xt.at[:, :biases.shape[0]].set(biases.T.astype(jnp.float32))
        return call(xt, prep)

    @jax.jit
    def forward(biases):
        # Torch-interface output; prefer `table` (lane-dense, no transpose)
        # when the consumer can gather from the transposed layout directly.
        return table(biases)[:nh, :biases.shape[0]].T

    return forward, table


def init_params(key, dim, num_heads):
    """Deterministic synthetic parameters matching the torch module shapes."""
    pos_dim = dim // 4
    keys = jax.random.split(key, 8)

    def linear(k, fan_in, fan_out):
        kw, kb = jax.random.split(k)
        bound = 1.0 / jnp.sqrt(fan_in)
        w = jax.random.uniform(kw, (fan_in, fan_out), jnp.float32, -bound, bound)
        b = jax.random.uniform(kb, (fan_out,), jnp.float32, -bound, bound)
        return w, b.reshape(1, fan_out)

    wp, bp = linear(keys[0], 2, pos_dim)
    w1, b1 = linear(keys[1], pos_dim, pos_dim)
    w2, b2 = linear(keys[2], pos_dim, pos_dim)
    w3, b3 = linear(keys[3], pos_dim, num_heads)

    def ln(k, d):
        kg, kb = jax.random.split(k)
        g = 1.0 + 0.1 * jax.random.normal(kg, (1, d), jnp.float32)
        b = 0.1 * jax.random.normal(kb, (1, d), jnp.float32)
        return g, b

    g1, be1 = ln(keys[4], pos_dim)
    g2, be2 = ln(keys[5], pos_dim)
    g3, be3 = ln(keys[6], pos_dim)

    return dict(wp=wp, bp=bp,
                g1=g1, be1=be1, w1=w1, b1=b1,
                g2=g2, be2=be2, w2=w2, b2=b2,
                g3=g3, be3=be3, w3=w3, b3=b3)


def _reference(biases, p, residual):
    """Pure-JAX reference mirroring the torch forward."""
    def blk(x, g, be, w, b):
        mu = jnp.mean(x, -1, keepdims=True)
        var = jnp.mean((x - mu) ** 2, -1, keepdims=True)
        h = (x - mu) / jnp.sqrt(var + 1e-5) * g + be
        return jnp.maximum(h, 0.0) @ w + b

    pos = biases @ p["wp"] + p["bp"]
    if residual:
        pos = pos + blk(pos, p["g1"], p["be1"], p["w1"], p["b1"])
        pos = pos + blk(pos, p["g2"], p["be2"], p["w2"], p["b2"])
        pos = blk(pos, p["g3"], p["be3"], p["w3"], p["b3"])
    else:
        pos = blk(pos, p["g1"], p["be1"], p["w1"], p["b1"])
        pos = blk(pos, p["g2"], p["be2"], p["w2"], p["b2"])
        pos = blk(pos, p["g3"], p["be3"], p["w3"], p["b3"])
    return pos


if __name__ == "__main__":
    # Small config: dim=32 -> pos_dim=8, num_heads=4, window size 8.
    dim, num_heads = 32, 4
    group_size = 8  # CrossFormer attention window

    # Relative-position input: (2*G-1)*(2*G-1) rows of (dy, dx) -> (225, 2).
    pos_h = jnp.arange(1 - group_size, group_size, dtype=jnp.float32)
    pos_w = jnp.arange(1 - group_size, group_size, dtype=jnp.float32)
    yy, xx = jnp.meshgrid(pos_h, pos_w, indexing="ij")
    biases = jnp.stack([yy.reshape(-1), xx.reshape(-1)], axis=1)

    key = jax.random.PRNGKey(0)
    params = init_params(key, dim, num_heads)

    # Build once: all parameter packing / pallas_call construction is hoisted
    # out of the call path.  In a real model the *result* of fwd(biases) would
    # additionally be cached per window size (it is fully static) or the
    # kernel fused into the consuming attention kernel.
    fwd_res, _table_res = make_dynamic_pos_bias(
        params, residual=True, n=biases.shape[0])
    fwd_nores, _ = make_dynamic_pos_bias(
        params, residual=False, n=biases.shape[0])

    out = jax.block_until_ready(fwd_res(biases))
    ref = _reference(biases, params, residual=True)
    assert out.shape == (biases.shape[0], num_heads)
    assert jnp.allclose(out, ref, atol=2e-4, rtol=2e-4), \
        float(jnp.max(jnp.abs(out - ref)))

    out_nr = jax.block_until_ready(fwd_nores(biases))
    ref_nr = _reference(biases, params, residual=False)
    assert jnp.allclose(out_nr, ref_nr, atol=2e-4, rtol=2e-4), \
        float(jnp.max(jnp.abs(out_nr - ref_nr)))

    print("KERNEL_OK")
</pallas_src>

<mosaic_0001>
module attributes {stable_mosaic.version = 11 : i64} {
  func.func @_dpb_kernel(%arg0: memref<2x256xf32, #tpu.memory_space<vmem>>, %arg1: memref<36x8x256xf32, #tpu.memory_space<vmem>>, %arg2: memref<8x256xf32, #tpu.memory_space<vmem>>) attributes {dimension_semantics = [], scalar_prefetch = 0 : i64, scratch_operands = 0 : i64, tpu.core_type = #tpu.core_type<tc>} {
    %c0 = arith.constant 0 : index
    %c0_0 = arith.constant 0 : index
    %0 = vector.load %arg0[%c0, %c0_0] : memref<2x256xf32, #tpu.memory_space<vmem>>, vector<2x256xf32>
    %c0_1 = arith.constant 0 : index
    %c0_2 = arith.constant 0 : index
    %c0_3 = arith.constant 0 : index
    %1 = vector.load %arg1[%c0_1, %c0_2, %c0_3] : memref<36x8x256xf32, #tpu.memory_space<vmem>>, vector<1x8x256xf32>
    %2 = vector.shape_cast %1 : vector<1x8x256xf32> to vector<8x256xf32>
    %3 = vector.extract_strided_slice %0 {offsets = [0, 0], sizes = [1, 256], strides = [1, 1]} : vector<2x256xf32> to vector<1x256xf32>
    %4 = vector.broadcast %3 : vector<1x256xf32> to vector<8x256xf32>
    %5 = arith.mulf %2, %4 : vector<8x256xf32>
    %c1 = arith.constant 1 : index
    %c0_4 = arith.constant 0 : index
    %c0_5 = arith.constant 0 : index
    %6 = vector.load %arg1[%c1, %c0_4, %c0_5] : memref<36x8x256xf32, #tpu.memory_space<vmem>>, vector<1x8x256xf32>
    %7 = vector.shape_cast %6 : vector<1x8x256xf32> to vector<8x256xf32>
    %8 = vector.extract_strided_slice %0 {offsets = [1, 0], sizes = [1, 256], strides = [1, 1]} : vector<2x256xf32> to vector<1x256xf32>
    %9 = vector.broadcast %8 : vector<1x256xf32> to vector<8x256xf32>
    %10 = arith.mulf %7, %9 : vector<8x256xf32>
    %c2 = arith.constant 2 : index
    %c0_6 = arith.constant 0 : index
    %c0_7 = arith.constant 0 : index
    %11 = vector.load %arg1[%c2, %c0_6, %c0_7] : memref<36x8x256xf32, #tpu.memory_space<vmem>>, vector<1x8x256xf32>
    %12 = vector.shape_cast %11 : vector<1x8x256xf32> to vector<8x256xf32>
    %13 = arith.addf %5, %10 : vector<8x256xf32>
    %14 = arith.addf %13, %12 : vector<8x256xf32>
    %cst = arith.constant dense<0.000000e+00> : vector<256xf32>
    %15 = vector.multi_reduction <add>, %14, %cst [0] : vector<8x256xf32> to vector<256xf32>
    %16 = vector.shape_cast %15 : vector<256xf32> to vector<1x256xf32>
    %17 = arith.mulf %14, %14 : vector<8x256xf32>
    %cst_8 = arith.constant dense<0.000000e+00> : vector<256xf32>
    %18 = vector.multi_reduction <add>, %17, %cst_8 [0] : vector<8x256xf32> to vector<256xf32>
    %19 = vector.shape_cast %18 : vector<256xf32> to vector<1x256xf32>
    %cst_9 = arith.constant 1.250000e-01 : f32
    %20 = vector.broadcast %cst_9 : f32 to vector<1x256xf32>
    %21 = arith.mulf %16, %20 : vector<1x256xf32>
    %cst_10 = arith.constant 1.250000e-01 : f32
    %22 = vector.broadcast %cst_10 : f32 to vector<1x256xf32>
    %23 = arith.mulf %19, %22 : vector<1x256xf32>
    %24 = arith.mulf %21, %21 : vector<1x256xf32>
    %25 = arith.subf %23, %24 : vector<1x256xf32>
    %cst_11 = arith.constant 0.000000e+00 : f32
    %26 = vector.broadcast %cst_11 : f32 to vector<1x256xf32>
    %27 = arith.maximumf %25, %26 : vector<1x256xf32>
    %28 = vector.broadcast %21 : vector<1x256xf32> to vector<8x256xf32>
    %29 = arith.subf %14, %28 : vector<8x256xf32>
    %cst_12 = arith.constant 9.99999974E-6 : f32
    %30 = vector.broadcast %cst_12 : f32 to vector<1x256xf32>
    %31 = arith.addf %27, %30 : vector<1x256xf32>
    %32 = math.rsqrt %31 : vector<1x256xf32>
    %33 = vector.broadcast %32 : vector<1x256xf32> to vector<8x256xf32>
    %34 = arith.mulf %29, %33 : vector<8x256xf32>
    %c12 = arith.constant 12 : index
    %c0_13 = arith.constant 0 : index
    %c0_14 = arith.constant 0 : index
    %35 = vector.load %arg1[%c12, %c0_13, %c0_14] : memref<36x8x256xf32, #tpu.memory_space<vmem>>, vector<1x8x256xf32>
    %36 = vector.shape_cast %35 : vector<1x8x256xf32> to vector<8x256xf32>
    %37 = arith.mulf %34, %36 : vector<8x256xf32>
    %c13 = arith.constant 13 : index
    %c0_15 = arith.constant 0 : index
    %c0_16 = arith.constant 0 : index
    %38 = vector.load %arg1[%c13, %c0_15, %c0_16] : memref<36x8x256xf32, #tpu.memory_space<vmem>>, vector<1x8x256xf32>
    %39 = vector.shape_cast %38 : vector<1x8x256xf32> to vector<8x256xf32>
    %40 = arith.addf %37, %39 : vector<8x256xf32>
    %cst_17 = arith.constant 0.000000e+00 : f32
    %41 = vector.broadcast %cst_17 : f32 to vector<8x256xf32>
    %42 = arith.maximumf %40, %41 : vector<8x256xf32>
    %c3 = arith.constant 3 : index
    %c0_18 = arith.constant 0 : index
    %c0_19 = arith.constant 0 : index
    %43 = vector.load %arg1[%c3, %c0_18, %c0_19] : memref<36x8x256xf32, #tpu.memory_space<vmem>>, vector<1x8x256xf32>
    %44 = vector.shape_cast %43 : vector<1x8x256xf32> to vector<8x256xf32>
    %45 = vector.extract_strided_slice %42 {offsets = [0, 0], sizes = [1, 256], strides = [1, 1]} : vector<8x256xf32> to vector<1x256xf32>
    %46 = vector.broadcast %45 : vector<1x256xf32> to vector<8x256xf32>
    %47 = arith.mulf %44, %46 : vector<8x256xf32>
    %c4 = arith.constant 4 : index
    %c0_20 = arith.constant 0 : index
    %c0_21 = arith.constant 0 : index
    %48 = vector.load %arg1[%c4, %c0_20, %c0_21] : memref<36x8x256xf32, #tpu.memory_space<vmem>>, vector<1x8x256xf32>
    %49 = vector.shape_cast %48 : vector<1x8x256xf32> to vector<8x256xf32>
    %50 = vector.extract_strided_slice %42 {offsets = [1, 0], sizes = [1, 256], strides = [1, 1]} : vector<8x256xf32> to vector<1x256xf32>
    %51 = vector.broadcast %50 : vector<1x256xf32> to vector<8x256xf32>
    %52 = arith.mulf %49, %51 : vector<8x256xf32>
    %c5 = arith.constant 5 : index
    %c0_22 = arith.constant 0 : index
    %c0_23 = arith.constant 0 : index
    %53 = vector.load %arg1[%c5, %c0_22, %c0_23] : memref<36x8x256xf32, #tpu.memory_space<vmem>>, vector<1x8x256xf32>
    %54 = vector.shape_cast %53 : vector<1x8x256xf32> to vector<8x256xf32>
    %55 = vector.extract_strided_slice %42 {offsets = [2, 0], sizes = [1, 256], strides = [1, 1]} : vector<8x256xf32> to vector<1x256xf32>
    %56 = vector.broadcast %55 : vector<1x256xf32> to vector<8x256xf32>
    %57 = arith.mulf %54, %56 : vector<8x256xf32>
    %c6 = arith.constant 6 : index
    %c0_24 = arith.constant 0 : index
    %c0_25 = arith.constant 0 : index
    %58 = vector.load %arg1[%c6, %c0_24, %c0_25] : memref<36x8x256xf32, #tpu.memory_space<vmem>>, vector<1x8x256xf32>
    %59 = vector.shape_cast %58 : vector<1x8x256xf32> to vector<8x256xf32>
    %60 = vector.extract_strided_slice %42 {offsets = [3, 0], sizes = [1, 256], strides = [1, 1]} : vector<8x256xf32> to vector<1x256xf32>
    %61 = vector.broadcast %60 : vector<1x256xf32> to vector<8x256xf32>
    %62 = arith.mulf %59, %61 : vector<8x256xf32>
    %c7 = arith.constant 7 : index
    %c0_26 = arith.constant 0 : index
    %c0_27 = arith.constant 0 : index
    %63 = vector.load %arg1[%c7, %c0_26, %c0_27] : memref<36x8x256xf32, #tpu.memory_space<vmem>>, vector<1x8x256xf32>
    %64 = vector.shape_cast %63 : vector<1x8x256xf32> to vector<8x256xf32>
    %65 = vector.extract_strided_slice %42 {offsets = [4, 0], sizes = [1, 256], strides = [1, 1]} : vector<8x256xf32> to vector<1x256xf32>
    %66 = vector.broadcast %65 : vector<1x256xf32> to vector<8x256xf32>
    %67 = arith.mulf %64, %66 : vector<8x256xf32>
    %c8 = arith.constant 8 : index
    %c0_28 = arith.constant 0 : index
    %c0_29 = arith.constant 0 : index
    %68 = vector.load %arg1[%c8, %c0_28, %c0_29] : memref<36x8x256xf32, #tpu.memory_space<vmem>>, vector<1x8x256xf32>
    %69 = vector.shape_cast %68 : vector<1x8x256xf32> to vector<8x256xf32>
    %70 = vector.extract_strided_slice %42 {offsets = [5, 0], sizes = [1, 256], strides = [1, 1]} : vector<8x256xf32> to vector<1x256xf32>
    %71 = vector.broadcast %70 : vector<1x256xf32> to vector<8x256xf32>
    %72 = arith.mulf %69, %71 : vector<8x256xf32>
    %c9 = arith.constant 9 : index
    %c0_30 = arith.constant 0 : index
    %c0_31 = arith.constant 0 : index
    %73 = vector.load %arg1[%c9, %c0_30, %c0_31] : memref<36x8x256xf32, #tpu.memory_space<vmem>>, vector<1x8x256xf32>
    %74 = vector.shape_cast %73 : vector<1x8x256xf32> to vector<8x256xf32>
    %75 = vector.extract_strided_slice %42 {offsets = [6, 0], sizes = [1, 256], strides = [1, 1]} : vector<8x256xf32> to vector<1x256xf32>
    %76 = vector.broadcast %75 : vector<1x256xf32> to vector<8x256xf32>
    %77 = arith.mulf %74, %76 : vector<8x256xf32>
    %c10 = arith.constant 10 : index
    %c0_32 = arith.constant 0 : index
    %c0_33 = arith.constant 0 : index
    %78 = vector.load %arg1[%c10, %c0_32, %c0_33] : memref<36x8x256xf32, #tpu.memory_space<vmem>>, vector<1x8x256xf32>
    %79 = vector.shape_cast %78 : vector<1x8x256xf32> to vector<8x256xf32>
    %80 = vector.extract_strided_slice %42 {offsets = [7, 0], sizes = [1, 256], strides = [1, 1]} : vector<8x256xf32> to vector<1x256xf32>
    %81 = vector.broadcast %80 : vector<1x256xf32> to vector<8x256xf32>
    %82 = arith.mulf %79, %81 : vector<8x256xf32>
    %c11 = arith.constant 11 : index
    %c0_34 = arith.constant 0 : index
    %c0_35 = arith.constant 0 : index
    %83 = vector.load %arg1[%c11, %c0_34, %c0_35] : memref<36x8x256xf32, #tpu.memory_space<vmem>>, vector<1x8x256xf32>
    %84 = vector.shape_cast %83 : vector<1x8x256xf32> to vector<8x256xf32>
    %85 = arith.addf %47, %52 : vector<8x256xf32>
    %86 = arith.addf %57, %62 : vector<8x256xf32>
    %87 = arith.addf %67, %72 : vector<8x256xf32>
    %88 = arith.addf %77, %82 : vector<8x256xf32>
    %89 = arith.addf %85, %86 : vector<8x256xf32>
    %90 = arith.addf %87, %88 : vector<8x256xf32>
    %91 = arith.addf %89, %90 : vector<8x256xf32>
    %92 = arith.addf %91, %84 : vector<8x256xf32>
    %93 = arith.addf %14, %92 : vector<8x256xf32>
    %cst_36 = arith.constant dense<0.000000e+00> : vector<256xf32>
    %94 = vector.multi_reduction <add>, %93, %cst_36 [0] : vector<8x256xf32> to vector<256xf32>
    %95 = vector.shape_cast %94 : vector<256xf32> to vector<1x256xf32>
    %96 = arith.mulf %93, %93 : vector<8x256xf32>
    %cst_37 = arith.constant dense<0.000000e+00> : vector<256xf32>
    %97 = vector.multi_reduction <add>, %96, %cst_37 [0] : vector<8x256xf32> to vector<256xf32>
    %98 = vector.shape_cast %97 : vector<256xf32> to vector<1x256xf32>
    %cst_38 = arith.constant 1.250000e-01 : f32
    %99 = vector.broadcast %cst_38 : f32 to vector<1x256xf32>
    %100 = arith.mulf %95, %99 : vector<1x256xf32>
    %cst_39 = arith.constant 1.250000e-01 : f32
    %101 = vector.broadcast %cst_39 : f32 to vector<1x256xf32>
    %102 = arith.mulf %98, %101 : vector<1x256xf32>
    %103 = arith.mulf %100, %100 : vector<1x256xf32>
    %104 = arith.subf %102, %103 : vector<1x256xf32>
    %cst_40 = arith.constant 0.000000e+00 : f32
    %105 = vector.broadcast %cst_40 : f32 to vector<1x256xf32>
    %106 = arith.maximumf %104, %105 : vector<1x256xf32>
    %107 = vector.broadcast %100 : vector<1x256xf32> to vector<8x256xf32>
    %108 = arith.subf %93, %107 : vector<8x256xf32>
    %cst_41 = arith.constant 9.99999974E-6 : f32
    %109 = vector.broadcast %cst_41 : f32 to vector<1x256xf32>
    %110 = arith.addf %106, %109 : vector<1x256xf32>
    %111 = math.rsqrt %110 : vector<1x256xf32>
    %112 = vector.broadcast %111 : vector<1x256xf32> to vector<8x256xf32>
    %113 = arith.mulf %108, %112 : vector<8x256xf32>
    %c23 = arith.constant 23 : index
    %c0_42 = arith.constant 0 : index
    %c0_43 = arith.constant 0 : index
    %114 = vector.load %arg1[%c23, %c0_42, %c0_43] : memref<36x8x256xf32, #tpu.memory_space<vmem>>, vector<1x8x256xf32>
    %115 = vector.shape_cast %114 : vector<1x8x256xf32> to vector<8x256xf32>
    %116 = arith.mulf %113, %115 : vector<8x256xf32>
    %c24 = arith.constant 24 : index
    %c0_44 = arith.constant 0 : index
    %c0_45 = arith.constant 0 : index
    %117 = vector.load %arg1[%c24, %c0_44, %c0_45] : memref<36x8x256xf32, #tpu.memory_space<vmem>>, vector<1x8x256xf32>
    %118 = vector.shape_cast %117 : vector<1x8x256xf32> to vector<8x256xf32>
    %119 = arith.addf %116, %118 : vector<8x256xf32>
    %cst_46 = arith.constant 0.000000e+00 : f32
    %120 = vector.broadcast %cst_46 : f32 to vector<8x256xf32>
    %121 = arith.maximumf %119, %120 : vector<8x256xf32>
    %c14 = arith.constant 14 : index
    %c0_47 = arith.constant 0 : index
    %c0_48 = arith.constant 0 : index
    %122 = vector.load %arg1[%c14, %c0_47, %c0_48] : memref<36x8x256xf32, #tpu.memory_space<vmem>>, vector<1x8x256xf32>
    %123 = vector.shape_cast %122 : vector<1x8x256xf32> to vector<8x256xf32>
    %124 = vector.extract_strided_slice %121 {offsets = [0, 0], sizes = [1, 256], strides = [1, 1]} : vector<8x256xf32> to vector<1x256xf32>
    %125 = vector.broadcast %124 : vector<1x256xf32> to vector<8x256xf32>
    %126 = arith.mulf %123, %125 : vector<8x256xf32>
    %c15 = arith.constant 15 : index
    %c0_49 = arith.constant 0 : index
    %c0_50 = arith.constant 0 : index
    %127 = vector.load %arg1[%c15, %c0_49, %c0_50] : memref<36x8x256xf32, #tpu.memory_space<vmem>>, vector<1x8x256xf32>
    %128 = vector.shape_cast %127 : vector<1x8x256xf32> to vector<8x256xf32>
    %129 = vector.extract_strided_slice %121 {offsets = [1, 0], sizes = [1, 256], strides = [1, 1]} : vector<8x256xf32> to vector<1x256xf32>
    %130 = vector.broadcast %129 : vector<1x256xf32> to vector<8x256xf32>
    %131 = arith.mulf %128, %130 : vector<8x256xf32>
    %c16 = arith.constant 16 : index
    %c0_51 = arith.constant 0 : index
    %c0_52 = arith.constant 0 : index
    %132 = vector.load %arg1[%c16, %c0_51, %c0_52] : memref<36x8x256xf32, #tpu.memory_space<vmem>>, vector<1x8x256xf32>
    %133 = vector.shape_cast %132 : vector<1x8x256xf32> to vector<8x256xf32>
    %134 = vector.extract_strided_slice %121 {offsets = [2, 0], sizes = [1, 256], strides = [1, 1]} : vector<8x256xf32> to vector<1x256xf32>
    %135 = vector.broadcast %134 : vector<1x256xf32> to vector<8x256xf32>
    %136 = arith.mulf %133, %135 : vector<8x256xf32>
    %c17 = arith.constant 17 : index
    %c0_53 = arith.constant 0 : index
    %c0_54 = arith.constant 0 : index
    %137 = vector.load %arg1[%c17, %c0_53, %c0_54] : memref<36x8x256xf32, #tpu.memory_space<vmem>>, vector<1x8x256xf32>
    %138 = vector.shape_cast %137 : vector<1x8x256xf32> to vector<8x256xf32>
    %139 = vector.extract_strided_slice %121 {offsets = [3, 0], sizes = [1, 256], strides = [1, 1]} : vector<8x256xf32> to vector<1x256xf32>
    %140 = vector.broadcast %139 : vector<1x256xf32> to vector<8x256xf32>
    %141 = arith.mulf %138, %140 : vector<8x256xf32>
    %c18 = arith.constant 18 : index
    %c0_55 = arith.constant 0 : index
    %c0_56 = arith.constant 0 : index
    %142 = vector.load %arg1[%c18, %c0_55, %c0_56] : memref<36x8x256xf32, #tpu.memory_space<vmem>>, vector<1x8x256xf32>
    %143 = vector.shape_cast %142 : vector<1x8x256xf32> to vector<8x256xf32>
    %144 = vector.extract_strided_slice %121 {offsets = [4, 0], sizes = [1, 256], strides = [1, 1]} : vector<8x256xf32> to vector<1x256xf32>
    %145 = vector.broadcast %144 : vector<1x256xf32> to vector<8x256xf32>
    %146 = arith.mulf %143, %145 : vector<8x256xf32>
    %c19 = arith.constant 19 : index
    %c0_57 = arith.constant 0 : index
    %c0_58 = arith.constant 0 : index
    %147 = vector.load %arg1[%c19, %c0_57, %c0_58] : memref<36x8x256xf32, #tpu.memory_space<vmem>>, vector<1x8x256xf32>
    %148 = vector.shape_cast %147 : vector<1x8x256xf32> to vector<8x256xf32>
    %149 = vector.extract_strided_slice %121 {offsets = [5, 0], sizes = [1, 256], strides = [1, 1]} : vector<8x256xf32> to vector<1x256xf32>
    %150 = vector.broadcast %149 : vector<1x256xf32> to vector<8x256xf32>
    %151 = arith.mulf %148, %150 : vector<8x256xf32>
    %c20 = arith.constant 20 : index
    %c0_59 = arith.constant 0 : index
    %c0_60 = arith.constant 0 : index
    %152 = vector.load %arg1[%c20, %c0_59, %c0_60] : memref<36x8x256xf32, #tpu.memory_space<vmem>>, vector<1x8x256xf32>
    %153 = vector.shape_cast %152 : vector<1x8x256xf32> to vector<8x256xf32>
    %154 = vector.extract_strided_slice %121 {offsets = [6, 0], sizes = [1, 256], strides = [1, 1]} : vector<8x256xf32> to vector<1x256xf32>
    %155 = vector.broadcast %154 : vector<1x256xf32> to vector<8x256xf32>
    %156 = arith.mulf %153, %155 : vector<8x256xf32>
    %c21 = arith.constant 21 : index
    %c0_61 = arith.constant 0 : index
    %c0_62 = arith.constant 0 : index
    %157 = vector.load %arg1[%c21, %c0_61, %c0_62] : memref<36x8x256xf32, #tpu.memory_space<vmem>>, vector<1x8x256xf32>
    %158 = vector.shape_cast %157 : vector<1x8x256xf32> to vector<8x256xf32>
    %159 = vector.extract_strided_slice %121 {offsets = [7, 0], sizes = [1, 256], strides = [1, 1]} : vector<8x256xf32> to vector<1x256xf32>
    %160 = vector.broadcast %159 : vector<1x256xf32> to vector<8x256xf32>
    %161 = arith.mulf %158, %160 : vector<8x256xf32>
    %c22 = arith.constant 22 : index
    %c0_63 = arith.constant 0 : index
    %c0_64 = arith.constant 0 : index
    %162 = vector.load %arg1[%c22, %c0_63, %c0_64] : memref<36x8x256xf32, #tpu.memory_space<vmem>>, vector<1x8x256xf32>
    %163 = vector.shape_cast %162 : vector<1x8x256xf32> to vector<8x256xf32>
    %164 = arith.addf %126, %131 : vector<8x256xf32>
    %165 = arith.addf %136, %141 : vector<8x256xf32>
    %166 = arith.addf %146, %151 : vector<8x256xf32>
    %167 = arith.addf %156, %161 : vector<8x256xf32>
    %168 = arith.addf %164, %165 : vector<8x256xf32>
    %169 = arith.addf %166, %167 : vector<8x256xf32>
    %170 = arith.addf %168, %169 : vector<8x256xf32>
    %171 = arith.addf %170, %163 : vector<8x256xf32>
    %172 = arith.addf %93, %171 : vector<8x256xf32>
    %cst_65 = arith.constant dense<0.000000e+00> : vector<256xf32>
    %173 = vector.multi_reduction <add>, %172, %cst_65 [0] : vector<8x256xf32> to vector<256xf32>
    %174 = vector.shape_cast %173 : vector<256xf32> to vector<1x256xf32>
    %175 = arith.mulf %172, %172 : vector<8x256xf32>
    %cst_66 = arith.constant dense<0.000000e+00> : vector<256xf32>
    %176 = vector.multi_reduction <add>, %175, %cst_66 [0] : vector<8x256xf32> to vector<256xf32>
    %177 = vector.shape_cast %176 : vector<256xf32> to vector<1x256xf32>
    %cst_67 = arith.constant 1.250000e-01 : f32
    %178 = vector.broadcast %cst_67 : f32 to vector<1x256xf32>
    %179 = arith.mulf %174, %178 : vector<1x256xf32>
    %cst_68 = arith.constant 1.250000e-01 : f32
    %180 = vector.broadcast %cst_68 : f32 to vector<1x256xf32>
    %181 = arith.mulf %177, %180 : vector<1x256xf32>
    %182 = arith.mulf %179, %179 : vector<1x256xf32>
    %183 = arith.subf %181, %182 : vector<1x256xf32>
    %cst_69 = arith.constant 0.000000e+00 : f32
    %184 = vector.broadcast %cst_69 : f32 to vector<1x256xf32>
    %185 = arith.maximumf %183, %184 : vector<1x256xf32>
    %186 = vector.broadcast %179 : vector<1x256xf32> to vector<8x256xf32>
    %187 = arith.subf %172, %186 : vector<8x256xf32>
    %cst_70 = arith.constant 9.99999974E-6 : f32
    %188 = vector.broadcast %cst_70 : f32 to vector<1x256xf32>
    %189 = arith.addf %185, %188 : vector<1x256xf32>
    %190 = math.rsqrt %189 : vector<1x256xf32>
    %191 = vector.broadcast %190 : vector<1x256xf32> to vector<8x256xf32>
    %192 = arith.mulf %187, %191 : vector<8x256xf32>
    %c34 = arith.constant 34 : index
    %c0_71 = arith.constant 0 : index
    %c0_72 = arith.constant 0 : index
    %193 = vector.load %arg1[%c34, %c0_71, %c0_72] : memref<36x8x256xf32, #tpu.memory_space<vmem>>, vector<1x8x256xf32>
    %194 = vector.shape_cast %193 : vector<1x8x256xf32> to vector<8x256xf32>
    %195 = arith.mulf %192, %194 : vector<8x256xf32>
    %c35 = arith.constant 35 : index
    %c0_73 = arith.constant 0 : index
    %c0_74 = arith.constant 0 : index
    %196 = vector.load %arg1[%c35, %c0_73, %c0_74] : memref<36x8x256xf32, #tpu.memory_space<vmem>>, vector<1x8x256xf32>
    %197 = vector.shape_cast %196 : vector<1x8x256xf32> to vector<8x256xf32>
    %198 = arith.addf %195, %197 : vector<8x256xf32>
    %cst_75 = arith.constant 0.000000e+00 : f32
    %199 = vector.broadcast %cst_75 : f32 to vector<8x256xf32>
    %200 = arith.maximumf %198, %199 : vector<8x256xf32>
    %c25 = arith.constant 25 : index
    %c0_76 = arith.constant 0 : index
    %c0_77 = arith.constant 0 : index
    %201 = vector.load %arg1[%c25, %c0_76, %c0_77] : memref<36x8x256xf32, #tpu.memory_space<vmem>>, vector<1x8x256xf32>
    %202 = vector.shape_cast %201 : vector<1x8x256xf32> to vector<8x256xf32>
    %203 = vector.extract_strided_slice %200 {offsets = [0, 0], sizes = [1, 256], strides = [1, 1]} : vector<8x256xf32> to vector<1x256xf32>
    %204 = vector.broadcast %203 : vector<1x256xf32> to vector<8x256xf32>
    %205 = arith.mulf %202, %204 : vector<8x256xf32>
    %c26 = arith.constant 26 : index
    %c0_78 = arith.constant 0 : index
    %c0_79 = arith.constant 0 : index
    %206 = vector.load %arg1[%c26, %c0_78, %c0_79] : memref<36x8x256xf32, #tpu.memory_space<vmem>>, vector<1x8x256xf32>
    %207 = vector.shape_cast %206 : vector<1x8x256xf32> to vector<8x256xf32>
    %208 = vector.extract_strided_slice %200 {offsets = [1, 0], sizes = [1, 256], strides = [1, 1]} : vector<8x256xf32> to vector<1x256xf32>
    %209 = vector.broadcast %208 : vector<1x256xf32> to vector<8x256xf32>
    %210 = arith.mulf %207, %209 : vector<8x256xf32>
    %c27 = arith.constant 27 : index
    %c0_80 = arith.constant 0 : index
    %c0_81 = arith.constant 0 : index
    %211 = vector.load %arg1[%c27, %c0_80, %c0_81] : memref<36x8x256xf32, #tpu.memory_space<vmem>>, vector<1x8x256xf32>
    %212 = vector.shape_cast %211 : vector<1x8x256xf32> to vector<8x256xf32>
    %213 = vector.extract_strided_slice %200 {offsets = [2, 0], sizes = [1, 256], strides = [1, 1]} : vector<8x256xf32> to vector<1x256xf32>
    %214 = vector.broadcast %213 : vector<1x256xf32> to vector<8x256xf32>
    %215 = arith.mulf %212, %214 : vector<8x256xf32>
    %c28 = arith.constant 28 : index
    %c0_82 = arith.constant 0 : index
    %c0_83 = arith.constant 0 : index
    %216 = vector.load %arg1[%c28, %c0_82, %c0_83] : memref<36x8x256xf32, #tpu.memory_space<vmem>>, vector<1x8x256xf32>
    %217 = vector.shape_cast %216 : vector<1x8x256xf32> to vector<8x256xf32>
    %218 = vector.extract_strided_slice %200 {offsets = [3, 0], sizes = [1, 256], strides = [1, 1]} : vector<8x256xf32> to vector<1x256xf32>
    %219 = vector.broadcast %218 : vector<1x256xf32> to vector<8x256xf32>
    %220 = arith.mulf %217, %219 : vector<8x256xf32>
    %c29 = arith.constant 29 : index
    %c0_84 = arith.constant 0 : index
    %c0_85 = arith.constant 0 : index
    %221 = vector.load %arg1[%c29, %c0_84, %c0_85] : memref<36x8x256xf32, #tpu.memory_space<vmem>>, vector<1x8x256xf32>
    %222 = vector.shape_cast %221 : vector<1x8x256xf32> to vector<8x256xf32>
    %223 = vector.extract_strided_slice %200 {offsets = [4, 0], sizes = [1, 256], strides = [1, 1]} : vector<8x256xf32> to vector<1x256xf32>
    %224 = vector.broadcast %223 : vector<1x256xf32> to vector<8x256xf32>
    %225 = arith.mulf %222, %224 : vector<8x256xf32>
    %c30 = arith.constant 30 : index
    %c0_86 = arith.constant 0 : index
    %c0_87 = arith.constant 0 : index
    %226 = vector.load %arg1[%c30, %c0_86, %c0_87] : memref<36x8x256xf32, #tpu.memory_space<vmem>>, vector<1x8x256xf32>
    %227 = vector.shape_cast %226 : vector<1x8x256xf32> to vector<8x256xf32>
    %228 = vector.extract_strided_slice %200 {offsets = [5, 0], sizes = [1, 256], strides = [1, 1]} : vector<8x256xf32> to vector<1x256xf32>
    %229 = vector.broadcast %228 : vector<1x256xf32> to vector<8x256xf32>
    %230 = arith.mulf %227, %229 : vector<8x256xf32>
    %c31 = arith.constant 31 : index
    %c0_88 = arith.constant 0 : index
    %c0_89 = arith.constant 0 : index
    %231 = vector.load %arg1[%c31, %c0_88, %c0_89] : memref<36x8x256xf32, #tpu.memory_space<vmem>>, vector<1x8x256xf32>
    %232 = vector.shape_cast %231 : vector<1x8x256xf32> to vector<8x256xf32>
    %233 = vector.extract_strided_slice %200 {offsets = [6, 0], sizes = [1, 256], strides = [1, 1]} : vector<8x256xf32> to vector<1x256xf32>
    %234 = vector.broadcast %233 : vector<1x256xf32> to vector<8x256xf32>
    %235 = arith.mulf %232, %234 : vector<8x256xf32>
    %c32 = arith.constant 32 : index
    %c0_90 = arith.constant 0 : index
    %c0_91 = arith.constant 0 : index
    %236 = vector.load %arg1[%c32, %c0_90, %c0_91] : memref<36x8x256xf32, #tpu.memory_space<vmem>>, vector<1x8x256xf32>
    %237 = vector.shape_cast %236 : vector<1x8x256xf32> to vector<8x256xf32>
    %238 = vector.extract_strided_slice %200 {offsets = [7, 0], sizes = [1, 256], strides = [1, 1]} : vector<8x256xf32> to vector<1x256xf32>
    %239 = vector.broadcast %238 : vector<1x256xf32> to vector<8x256xf32>
    %240 = arith.mulf %237, %239 : vector<8x256xf32>
    %c33 = arith.constant 33 : index
    %c0_92 = arith.constant 0 : index
    %c0_93 = arith.constant 0 : index
    %241 = vector.load %arg1[%c33, %c0_92, %c0_93] : memref<36x8x256xf32, #tpu.memory_space<vmem>>, vector<1x8x256xf32>
    %242 = vector.shape_cast %241 : vector<1x8x256xf32> to vector<8x256xf32>
    %243 = arith.addf %205, %210 : vector<8x256xf32>
    %244 = arith.addf %215, %220 : vector<8x256xf32>
    %245 = arith.addf %225, %230 : vector<8x256xf32>
    %246 = arith.addf %235, %240 : vector<8x256xf32>
    %247 = arith.addf %243, %244 : vector<8x256xf32>
    %248 = arith.addf %245, %246 : vector<8x256xf32>
    %249 = arith.addf %247, %248 : vector<8x256xf32>
    %250 = arith.addf %249, %242 : vector<8x256xf32>
    %c0_94 = arith.constant 0 : index
    %c0_95 = arith.constant 0 : index
    %251 = vector.load %arg2[%c0_94, %c0_95] : memref<8x256xf32, #tpu.memory_space<vmem>>, vector<8x256xf32>
    tpu.vector_store %arg2[%c0_94, %c0_95], %250 {strides = array<i32>} : memref<8x256xf32, #tpu.memory_space<vmem>>, vector<8x256xf32>,
    return
  }
}

</mosaic_0001>

<bundles_post_ra>
// kernel: table.1
= control target key start
LH: loop header
LB: loop body
LE: loop exit
PB: predicated region body
PF: predicated region fallthrough
CT: control target
= control target key end

     0   :  { %7 = vsyncpa [#allocation3], 0  ;;  %s862_s0 = inlined_call_operand.vmem [shape: f32[2,256], index: 0, kind: input, shape index: {}]   ;;  %s863_s1 = inlined_call_operand.hbm [shape: f32[36,8,256], index: 1, kind: input, shape index: {}]   ;;  %s864_s2 = inlined_call_operand.hbm [shape: f32[8,256], index: 2, kind: output, shape index: {}]  }
   0x1   :  { %8 = vsyncpa [#allocation4], 0  ;;  %s702_s9 = smov [#allocation2]   ;;  %s654_s13 = scalar_lea.hbm %s863_s1, 9216 }
   0x2   :  { %s16_s10 = sshll.u32 %s702_s9, 4  ;;  %p655_p0 = scmp.ne.s32.totalorder %s863_s1, %s654_s13  ;;  %s17_s10 = int_to_ptr.vmem [resolvable:$true] %s16_s10 }
   0x3   :  { %p658_p1 = scmp.lt.u32.totalorder %s654_s13, %s863_s1 }
   0x5   :  { %p660_p2 = pnand %p658_p1, %p655_p0 }
   0x7   :  { %663 = shalt.err (!%p660_p2)
}
   0x8   :  { %s664_s18 = scalar_lea.vmem %s17_s10, 9216  ;;  %p669_p4 = scmp.lt.s32.totalorder %s17_s10, %s17_s10 }
   0x9   :  { %p665_p3 = scmp.ne.s32.totalorder %s17_s10, %s664_s18  ;;  %p670_p5 = scmp.lt.s32.totalorder %s664_s18, %s664_s18 }
   0xb   :  { %p671_p6 = por %p670_p5, %p669_p4 }
   0xd   :  { %p672_p7 = pnand %p671_p6, %p665_p3 }
   0xf   :  { %675 = shalt.err (!%p672_p7)
}
  0x10   :  { %s703_s19 = smov 256   ;;  %s704_s20 = smov 16  }
  0x11   :  { %22 = dma.hbm_to_vmem [thread:$0]  %s863_s1, 9216, %s17_s10, [#allocation3], %s703_s19, %s703_s19, %s704_s20  }
  0x12   :  { %698 = dma.done.wait [#allocation3], 9216  }
  0x13   :  { %699 = vsyncadd [#allocation3], 4294958080  ;;  %v30_v0 = vlaneseq  ;;  %v26_v6 = vld [vmem:[%s862_s0] sm:$0xf]  ;;  %v28_v12 = vld [vmem:[#allocation2 + $0x8] sm:$0xff]  ;;  %s705_s0 = smov [#allocation5]  }
  0x14   :  { %v27_v7 = vld [vmem:[#allocation2] sm:$0xff]  ;;  %v51_v13 = vld [vmem:[#allocation2 + $0x10] sm:$0xff]  ;;  %v52_v14 = vld [vmem:[#allocation2 + $0x18] sm:$0xff]  ;;  %s629_s1 = sshll.u32 %s705_s0, 4  ;;  %s630_s1 = int_to_ptr.vmem [resolvable:$true] %s629_s1 }
  0x15   :  { %v733_v1 = vshrl.u32 %v30_v0, 7  ;;  %v74_v23 = vld [vmem:[#allocation2 + $0x20] sm:$0xff]  ;;  %v75_v24 = vld [vmem:[#allocation2 + $0x28] sm:$0xff]  ;;  %s676_s25 = scalar_lea.vmem %s630_s1, 256  ;;  %p681_p9 = scmp.lt.s32.totalorder %s630_s1, %s630_s1 }
  0x16   :  { %p677_p8 = scmp.ne.s32.totalorder %s630_s1, %s676_s25  ;;  %p682_p10 = scmp.lt.s32.totalorder %s676_s25, %s676_s25 }
  0x17   :  { %v736_v2 = vsub.s32 0, %v733_v1  ;;  %v739_v3 = vsub.s32 2, %v733_v1  ;;  %v742_v4 = vsub.s32 1, %v733_v1  ;;  %v745_v5 = vsub.s32 3, %v733_v1 }
  0x18   :  { %p683_p11 = por %p682_p10, %p681_p9 }
  0x19   :  { %v33_v8 = vrot.slane %v26_v6, %v736_v2  ;;  %v37_v9 = vrot.slane %v26_v6, %v739_v3  ;;  %v56_v10 = vrot.slane %v26_v6, %v742_v4  ;;  %v60_v11 = vrot.slane %v26_v6, %v745_v5 }
  0x1a   :  { %p684_p12 = pnand %p683_p11, %p677_p8 }
  0x1b   :  { %v43_v15 = vrot.slane %v33_v8, %v736_v2  ;;  %v47_v16 = vrot.slane %v37_v9, %v736_v2  ;;  %v66_v17 = vrot.slane %v56_v10, %v742_v4  ;;  %v70_v18 = vrot.slane %v60_v11, %v742_v4  ;;  %v125_v11 = vld [vmem:[#allocation2 + $0xc0] sm:$0xff] }
  0x1d   :  { %v48_v19 = vmul.f32 %v43_v15, %v27_v7  ;;  %v49_v20 = vmul.f32 %v47_v16, %v28_v12  ;;  %v71_v21 = vmul.f32 %v66_v17, %v51_v13  ;;  %v72_v22 = vmul.f32 %v70_v18, %v52_v14  ;;  %v126_v14 = vld [vmem:[#allocation2 + $0xc8] sm:$0xff]  ;;  %v130_v16 = vld [vmem:[#allocation2 + $0xd0] sm:$0xff]  ;;  %v131_v18 = vld [vmem:[#allocation2 + $0xd8] sm:$0xff] }
  0x1f   :  { %v76_v25 = vadd.f32 %v71_v21, %v48_v19  ;;  %v77_v26 = vadd.f32 %v72_v22, %v49_v20 }
  0x21   :  { %v758_v27 = vadd.f32 %v76_v25, %v74_v23  ;;  %v760_v28 = vadd.f32 %v77_v26, %v75_v24  ;;  %v137_v23 = vld [vmem:[#allocation2 + $0x30] sm:$0xff]  ;;  %v138_v24 = vld [vmem:[#allocation2 + $0x38] sm:$0xff]  ;;  %v773_v25 = vsub.s32 4, %v733_v1  ;;  %v776_v26 = vsub.s32 5, %v733_v1 }
  0x23   :  { %v80_v29 = vrot.slane %v758_v27, 4  ;;  %v86_v30 = vrot.slane %v760_v28, 4  ;;  %v92_v31 = vmul.f32 %v758_v27, %v758_v27  ;;  %v93_v32 = vmul.f32 %v760_v28, %v760_v28 }
  0x25   :  { %v81_v33 = vadd.f32 %v80_v29, %v758_v27  ;;  %v87_v34 = vadd.f32 %v86_v30, %v760_v28  ;;  %v94_v35 = vrot.slane %v92_v31, 4  ;;  %v100_v36 = vrot.slane %v93_v32, 4  ;;  %v150_v30 = vld [vmem:[#allocation2 + $0x40] sm:$0xff] }
  0x27   :  { %v82_v37 = vrot.slane %v81_v33, 2  ;;  %v88_v38 = vrot.slane %v87_v34, 2  ;;  %v95_v39 = vadd.f32 %v94_v35, %v92_v31  ;;  %v101_v40 = vadd.f32 %v100_v36, %v93_v32  ;;  %v163_v31 = vld [vmem:[#allocation2 + $0x50] sm:$0xff]  ;;  %v176_v32 = vld [vmem:[#allocation2 + $0x60] sm:$0xff]  ;;  %v151_v36 = vld [vmem:[#allocation2 + $0x48] sm:$0xff] }
  0x29   :  { %v83_v41 = vadd.f32 %v82_v37, %v81_v33  ;;  %v89_v42 = vadd.f32 %v88_v38, %v87_v34  ;;  %v96_v43 = vrot.slane %v95_v39, 2  ;;  %v102_v44 = vrot.slane %v101_v40, 2  ;;  %v164_v38 = vld [vmem:[#allocation2 + $0x58] sm:$0xff] }
  0x2a   :  { %v779_v33 = vsub.s32 6, %v733_v1  ;;  %v782_v34 = vsub.s32 7, %v733_v1 }
  0x2b   :  { %v84_v45 = vrot.slane %v83_v41, 1  ;;  %v90_v46 = vrot.slane %v89_v42, 1  ;;  %v97_v47 = vadd.f32 %v96_v43, %v95_v39  ;;  %v103_v48 = vadd.f32 %v102_v44, %v101_v40  ;;  %v177_v40 = vld [vmem:[#allocation2 + $0x68] sm:$0xff] }
  0x2d   :  { %v85_v49 = vadd.f32 %v84_v45, %v83_v41  ;;  %v91_v50 = vadd.f32 %v90_v46, %v89_v42  ;;  %v98_v51 = vrot.slane %v97_v47, 1  ;;  %v104_v52 = vrot.slane %v103_v48, 1 }
  0x2f   :  { %v99_v53 = vadd.f32 %v98_v51, %v97_v47  ;;  %v105_v54 = vadd.f32 %v104_v52, %v103_v48  ;;  %v106_v55 = vmul.f32 0.125, %v85_v49  ;;  %v107_v56 = vmul.f32 0.125, %v91_v50  ;;  %v189_v49 = vld [vmem:[#allocation2 + $0x70] sm:$0xff]  ;;  %v190_v50 = vld [vmem:[#allocation2 + $0x78] sm:$0xff] }
  0x31   :  { %v108_v57 = vmul.f32 0.125, %v99_v53  ;;  %v109_v58 = vmul.f32 0.125, %v105_v54  ;;  %v110_v59 = vmul.f32 %v106_v55, %v106_v55  ;;  %v111_v60 = vmul.f32 %v107_v56, %v107_v56 }
  0x32   :  { %v116_v8 = vsub.f32 %v758_v27, %v106_v55  ;;  %v117_v9 = vsub.f32 %v760_v28, %v107_v56  ;;  %v202_v55 = vld [vmem:[#allocation2 + $0x80] sm:$0xff]  ;;  %v203_v56 = vld [vmem:[#allocation2 + $0x88] sm:$0xff] }
  0x33   :  { %v112_v61 = vsub.f32 %v108_v57, %v110_v59  ;;  %v113_v62 = vsub.f32 %v109_v58, %v111_v60  ;;  %v215_v57 = vld [vmem:[#allocation2 + $0x90] sm:$0xff] }
  0x35   :  { %v114_v63 = vmax.f32 %v112_v61, 0.0  ;;  %v115_v0 = vmax.f32 %v113_v62, 0.0  ;;  %v216_v62 = vld [vmem:[#allocation2 + $0x98] sm:$0xff] }
  0x37   :  { %v118_v6 = vadd.f32 1e-05, %v114_v63  ;;  %v119_v7 = vadd.f32 1e-05, %v115_v0  ;;  %v228_v63 = vld [vmem:[#allocation2 + $0xa0] sm:$0xff]  ;;  %v229_v0 = vld [vmem:[#allocation2 + $0xa8] sm:$0xff] }
  0x39   :  { %642 = vrsqrt.f32 %v118_v6 }
  0x3a   :  { %644 = vrsqrt.f32 %v119_v7 }
  0x43   :  { %v643_v10 = vpop.eup %642 }
  0x44   :  { %v645_v12 = vpop.eup %644  ;;  %v122_v13 = vmul.f32 %v643_v10, %v116_v8 }
  0x45   :  { %v123_v15 = vmul.f32 %v645_v12, %v117_v9 }
  0x46   :  { %v127_v17 = vmul.f32 %v125_v11, %v122_v13 }
  0x47   :  { %v128_v19 = vmul.f32 %v126_v14, %v123_v15 }
  0x48   :  { %v132_v20 = vadd.f32 %v130_v16, %v127_v17 }
  0x49   :  { %v133_v21 = vadd.f32 %v131_v18, %v128_v19 }
  0x4a   :  { %v134_v22 = vmax.f32 %v132_v20, 0.0 }
  0x4b   :  { %v135_v29 = vmax.f32 %v133_v21, 0.0 }
  0x4c   :  { %v142_v35 = vrot.slane %v134_v22, %v736_v2  ;;  %v155_v37 = vrot.slane %v134_v22, %v742_v4  ;;  %v168_v39 = vrot.slane %v134_v22, %v739_v3  ;;  %v181_v41 = vrot.slane %v134_v22, %v745_v5 }
  0x4d   :  { %v146_v42 = vrot.slane %v135_v29, %v736_v2  ;;  %v159_v43 = vrot.slane %v135_v29, %v742_v4  ;;  %v172_v44 = vrot.slane %v135_v29, %v739_v3  ;;  %v185_v1 = vrot.slane %v135_v29, %v745_v5 }
  0x4e   :  { %v147_v45 = vmul.f32 %v142_v35, %v137_v23  ;;  %v160_v46 = vmul.f32 %v155_v37, %v150_v30  ;;  %v173_v47 = vmul.f32 %v168_v39, %v163_v31  ;;  %v186_v48 = vmul.f32 %v181_v41, %v176_v32  ;;  %v242_v37 = vld [vmem:[#allocation2 + $0xb8] sm:$0xff] }
  0x4f   :  { %v148_v51 = vmul.f32 %v146_v42, %v138_v24  ;;  %v161_v52 = vmul.f32 %v159_v43, %v151_v36  ;;  %v174_v53 = vmul.f32 %v172_v44, %v164_v38  ;;  %v187_v54 = vmul.f32 %v185_v1, %v177_v40  ;;  %v241_v36 = vld [vmem:[#allocation2 + $0xb0] sm:$0xff] }
  0x50   :  { %v194_v58 = vrot.slane %v134_v22, %v773_v25  ;;  %v198_v59 = vrot.slane %v135_v29, %v773_v25  ;;  %v207_v60 = vrot.slane %v134_v22, %v776_v26  ;;  %v211_v61 = vrot.slane %v135_v29, %v776_v26 }
  0x51   :  { %v220_v6 = vrot.slane %v134_v22, %v779_v33  ;;  %v224_v7 = vrot.slane %v135_v29, %v779_v33  ;;  %v233_v8 = vrot.slane %v134_v22, %v782_v34  ;;  %v237_v9 = vrot.slane %v135_v29, %v782_v34 }
  0x52   :  { %v199_v10 = vmul.f32 %v194_v58, %v189_v49  ;;  %v200_v11 = vmul.f32 %v198_v59, %v190_v50  ;;  %v212_v12 = vmul.f32 %v207_v60, %v202_v55  ;;  %v213_v13 = vmul.f32 %v211_v61, %v203_v56 }
  0x53   :  { %v225_v14 = vmul.f32 %v220_v6, %v215_v57  ;;  %v226_v15 = vmul.f32 %v224_v7, %v216_v62  ;;  %v238_v16 = vmul.f32 %v233_v8, %v228_v63  ;;  %v239_v17 = vmul.f32 %v237_v9, %v229_v0 }
  0x54   :  { %v243_v18 = vadd.f32 %v160_v46, %v147_v45  ;;  %v244_v19 = vadd.f32 %v161_v52, %v148_v51  ;;  %v245_v20 = vadd.f32 %v186_v48, %v173_v47  ;;  %v246_v21 = vadd.f32 %v187_v54, %v174_v53 }
  0x55   :  { %v247_v23 = vadd.f32 %v212_v12, %v199_v10  ;;  %v248_v24 = vadd.f32 %v213_v13, %v200_v11  ;;  %v249_v30 = vadd.f32 %v238_v16, %v225_v14  ;;  %v250_v31 = vadd.f32 %v239_v17, %v226_v15 }
  0x56   :  { %v251_v32 = vadd.f32 %v245_v20, %v243_v18  ;;  %v252_v22 = vadd.f32 %v246_v21, %v244_v19 }
  0x57   :  { %v253_v35 = vadd.f32 %v249_v30, %v247_v23  ;;  %v254_v29 = vadd.f32 %v250_v31, %v248_v24  ;;  %v306_v24 = vld [vmem:[#allocation2 + $0x170] sm:$0xff] }
  0x59   :  { %v255_v38 = vadd.f32 %v253_v35, %v251_v32  ;;  %v256_v39 = vadd.f32 %v254_v29, %v252_v22  ;;  %v307_v32 = vld [vmem:[#allocation2 + $0x178] sm:$0xff]  ;;  %v311_v35 = vld [vmem:[#allocation2 + $0x180] sm:$0xff] }
  0x5b   :  { %v257_v40 = vadd.f32 %v255_v38, %v241_v36  ;;  %v258_v41 = vadd.f32 %v256_v39, %v242_v37  ;;  %v312_v36 = vld [vmem:[#allocation2 + $0x188] sm:$0xff] }
  0x5d   :  { %v801_v42 = vadd.f32 %v257_v40, %v758_v27  ;;  %v804_v43 = vadd.f32 %v258_v41, %v760_v28  ;;  %v318_v41 = vld [vmem:[#allocation2 + $0xe0] sm:$0xff] }
  0x5f   :  { %v261_v44 = vrot.slane %v801_v42, 4  ;;  %v267_v1 = vrot.slane %v804_v43, 4  ;;  %v273_v45 = vmul.f32 %v801_v42, %v801_v42  ;;  %v274_v46 = vmul.f32 %v804_v43, %v804_v43 }
  0x61   :  { %v262_v47 = vadd.f32 %v261_v44, %v801_v42  ;;  %v268_v48 = vadd.f32 %v267_v1, %v804_v43  ;;  %v275_v49 = vrot.slane %v273_v45, 4  ;;  %v281_v27 = vrot.slane %v274_v46, 4  ;;  %v319_v44 = vld [vmem:[#allocation2 + $0xe8] sm:$0xff] }
  0x63   :  { %v263_v50 = vrot.slane %v262_v47, 2  ;;  %v269_v51 = vrot.slane %v268_v48, 2  ;;  %v276_v28 = vadd.f32 %v275_v49, %v273_v45  ;;  %v282_v52 = vadd.f32 %v281_v27, %v274_v46  ;;  %v331_v45 = vld [vmem:[#allocation2 + $0xf0] sm:$0xff]  ;;  %v344_v46 = vld [vmem:[#allocation2 + $0x100] sm:$0xff]  ;;  %v332_v49 = vld [vmem:[#allocation2 + $0xf8] sm:$0xff] }
  0x65   :  { %v264_v53 = vadd.f32 %v263_v50, %v262_v47  ;;  %v270_v54 = vadd.f32 %v269_v51, %v268_v48  ;;  %v277_v55 = vrot.slane %v276_v28, 2  ;;  %v283_v56 = vrot.slane %v282_v52, 2  ;;  %v357_v47 = vld [vmem:[#allocation2 + $0x110] sm:$0xff]  ;;  %v345_v50 = vld [vmem:[#allocation2 + $0x108] sm:$0xff] }
  0x67   :  { %v265_v57 = vrot.slane %v264_v53, 1  ;;  %v271_v58 = vrot.slane %v270_v54, 1  ;;  %v278_v59 = vadd.f32 %v277_v55, %v276_v28  ;;  %v284_v60 = vadd.f32 %v283_v56, %v282_v52  ;;  %v358_v28 = vld [vmem:[#allocation2 + $0x118] sm:$0xff] }
  0x69   :  { %v266_v61 = vadd.f32 %v265_v57, %v264_v53  ;;  %v272_v62 = vadd.f32 %v271_v58, %v270_v54  ;;  %v279_v63 = vrot.slane %v278_v59, 1  ;;  %v285_v0 = vrot.slane %v284_v60, 1 }
  0x6b   :  { %v280_v6 = vadd.f32 %v279_v63, %v278_v59  ;;  %v286_v7 = vadd.f32 %v285_v0, %v284_v60  ;;  %v287_v8 = vmul.f32 0.125, %v266_v61  ;;  %v288_v9 = vmul.f32 0.125, %v272_v62  ;;  %v370_v61 = vld [vmem:[#allocation2 + $0x120] sm:$0xff]  ;;  %v371_v62 = vld [vmem:[#allocation2 + $0x128] sm:$0xff] }
  0x6d   :  { %v289_v10 = vmul.f32 0.125, %v280_v6  ;;  %v290_v11 = vmul.f32 0.125, %v286_v7  ;;  %v291_v12 = vmul.f32 %v287_v8, %v287_v8  ;;  %v292_v13 = vmul.f32 %v288_v9, %v288_v9 }
  0x6e   :  { %v297_v20 = vsub.f32 %v801_v42, %v287_v8  ;;  %v298_v21 = vsub.f32 %v804_v43, %v288_v9  ;;  %v383_v8 = vld [vmem:[#allocation2 + $0x130] sm:$0xff]  ;;  %v384_v9 = vld [vmem:[#allocation2 + $0x138] sm:$0xff] }
  0x6f   :  { %v293_v14 = vsub.f32 %v289_v10, %v291_v12  ;;  %v294_v15 = vsub.f32 %v290_v11, %v292_v13  ;;  %v396_v10 = vld [vmem:[#allocation2 + $0x140] sm:$0xff] }
  0x71   :  { %v295_v16 = vmax.f32 %v293_v14, 0.0  ;;  %v296_v17 = vmax.f32 %v294_v15, 0.0  ;;  %v397_v15 = vld [vmem:[#allocation2 + $0x148] sm:$0xff] }
  0x73   :  { %v299_v18 = vadd.f32 1e-05, %v295_v16  ;;  %v300_v19 = vadd.f32 1e-05, %v296_v17  ;;  %v409_v16 = vld [vmem:[#allocation2 + $0x150] sm:$0xff]  ;;  %v410_v17 = vld [vmem:[#allocation2 + $0x158] sm:$0xff] }
  0x75   :  { %646 = vrsqrt.f32 %v299_v18 }
  0x76   :  { %648 = vrsqrt.f32 %v300_v19 }
  0x7f   :  { %v647_v23 = vpop.eup %646 }
  0x80   :  { %v649_v30 = vpop.eup %648  ;;  %v303_v31 = vmul.f32 %v647_v23, %v297_v20 }
  0x81   :  { %v304_v22 = vmul.f32 %v649_v30, %v298_v21 }
  0x82   :  { %v308_v29 = vmul.f32 %v306_v24, %v303_v31 }
  0x83   :  { %v309_v37 = vmul.f32 %v307_v32, %v304_v22 }
  0x84   :  { %v313_v38 = vadd.f32 %v311_v35, %v308_v29 }
  0x85   :  { %v314_v39 = vadd.f32 %v312_v36, %v309_v37 }
  0x86   :  { %v315_v40 = vmax.f32 %v313_v38, 0.0 }
  0x87   :  { %v316_v1 = vmax.f32 %v314_v39, 0.0 }
  0x88   :  { %v323_v48 = vrot.slane %v315_v40, %v736_v2  ;;  %v336_v27 = vrot.slane %v315_v40, %v742_v4  ;;  %v349_v51 = vrot.slane %v315_v40, %v739_v3  ;;  %v362_v52 = vrot.slane %v315_v40, %v745_v5 }
  0x89   :  { %v327_v53 = vrot.slane %v316_v1, %v736_v2  ;;  %v340_v54 = vrot.slane %v316_v1, %v742_v4  ;;  %v353_v55 = vrot.slane %v316_v1, %v739_v3  ;;  %v366_v56 = vrot.slane %v316_v1, %v745_v5 }
  0x8a   :  { %v328_v57 = vmul.f32 %v323_v48, %v318_v41  ;;  %v341_v58 = vmul.f32 %v336_v27, %v331_v45  ;;  %v354_v59 = vmul.f32 %v349_v51, %v344_v46  ;;  %v367_v60 = vmul.f32 %v362_v52, %v357_v47  ;;  %v423_v27 = vld [vmem:[#allocation2 + $0x168] sm:$0xff] }
  0x8b   :  { %v329_v63 = vmul.f32 %v327_v53, %v319_v44  ;;  %v342_v0 = vmul.f32 %v340_v54, %v332_v49  ;;  %v355_v6 = vmul.f32 %v353_v55, %v345_v50  ;;  %v368_v7 = vmul.f32 %v366_v56, %v358_v28  ;;  %v422_v49 = vld [vmem:[#allocation2 + $0x160] sm:$0xff] }
  0x8c   :  { %v375_v11 = vrot.slane %v315_v40, %v773_v25  ;;  %v379_v12 = vrot.slane %v316_v1, %v773_v25  ;;  %v388_v13 = vrot.slane %v315_v40, %v776_v26  ;;  %v392_v14 = vrot.slane %v316_v1, %v776_v26 }
  0x8d   :  { %v401_v18 = vrot.slane %v315_v40, %v779_v33  ;;  %v405_v19 = vrot.slane %v316_v1, %v779_v33  ;;  %v414_v20 = vrot.slane %v315_v40, %v782_v34  ;;  %v418_v21 = vrot.slane %v316_v1, %v782_v34 }
  0x8e   :  { %v380_v23 = vmul.f32 %v375_v11, %v370_v61  ;;  %v381_v24 = vmul.f32 %v379_v12, %v371_v62  ;;  %v393_v30 = vmul.f32 %v388_v13, %v383_v8  ;;  %v394_v31 = vmul.f32 %v392_v14, %v384_v9 }
  0x8f   :  { %v406_v32 = vmul.f32 %v401_v18, %v396_v10  ;;  %v407_v22 = vmul.f32 %v405_v19, %v397_v15  ;;  %v419_v35 = vmul.f32 %v414_v20, %v409_v16  ;;  %v420_v29 = vmul.f32 %v418_v21, %v410_v17 }
  0x90   :  { %v424_v36 = vadd.f32 %v341_v58, %v328_v57  ;;  %v425_v37 = vadd.f32 %v342_v0, %v329_v63  ;;  %v426_v38 = vadd.f32 %v367_v60, %v354_v59  ;;  %v427_v39 = vadd.f32 %v368_v7, %v355_v6 }
  0x91   :  { %v428_v41 = vadd.f32 %v393_v30, %v380_v23  ;;  %v429_v44 = vadd.f32 %v394_v31, %v381_v24  ;;  %v430_v45 = vadd.f32 %v419_v35, %v406_v32  ;;  %v431_v46 = vadd.f32 %v420_v29, %v407_v22 }
  0x92   :  { %v432_v47 = vadd.f32 %v426_v38, %v424_v36  ;;  %v433_v40 = vadd.f32 %v427_v39, %v425_v37 }
  0x93   :  { %v434_v48 = vadd.f32 %v430_v45, %v428_v41  ;;  %v435_v1 = vadd.f32 %v431_v46, %v429_v44  ;;  %v487_v44 = vld [vmem:[#allocation2 + $0x220] sm:$0xff] }
  0x95   :  { %v436_v50 = vadd.f32 %v434_v48, %v432_v47  ;;  %v437_v51 = vadd.f32 %v435_v1, %v433_v40  ;;  %v488_v47 = vld [vmem:[#allocation2 + $0x228] sm:$0xff]  ;;  %v492_v48 = vld [vmem:[#allocation2 + $0x230] sm:$0xff] }
  0x97   :  { %v438_v28 = vadd.f32 %v436_v50, %v422_v49  ;;  %v439_v52 = vadd.f32 %v437_v51, %v423_v27  ;;  %v493_v49 = vld [vmem:[#allocation2 + $0x238] sm:$0xff] }
  0x99   :  { %v440_v53 = vadd.f32 %v438_v28, %v801_v42  ;;  %v441_v54 = vadd.f32 %v439_v52, %v804_v43  ;;  %v499_v52 = vld [vmem:[#allocation2 + $0x190] sm:$0xff] }
  0x9b   :  { %v442_v55 = vrot.slane %v440_v53, 4  ;;  %v448_v56 = vrot.slane %v441_v54, 4  ;;  %v454_v57 = vmul.f32 %v440_v53, %v440_v53  ;;  %v455_v58 = vmul.f32 %v441_v54, %v441_v54 }
  0x9d   :  { %v443_v59 = vadd.f32 %v442_v55, %v440_v53  ;;  %v449_v60 = vadd.f32 %v448_v56, %v441_v54  ;;  %v456_v61 = vrot.slane %v454_v57, 4  ;;  %v462_v62 = vrot.slane %v455_v58, 4  ;;  %v500_v55 = vld [vmem:[#allocation2 + $0x198] sm:$0xff] }
  0x9f   :  { %v444_v63 = vrot.slane %v443_v59, 2  ;;  %v450_v0 = vrot.slane %v449_v60, 2  ;;  %v457_v6 = vadd.f32 %v456_v61, %v454_v57  ;;  %v463_v7 = vadd.f32 %v462_v62, %v455_v58  ;;  %v512_v57 = vld [vmem:[#allocation2 + $0x1a0] sm:$0xff]  ;;  %v525_v58 = vld [vmem:[#allocation2 + $0x1b0] sm:$0xff]  ;;  %v526_v61 = vld [vmem:[#allocation2 + $0x1b8] sm:$0xff] }
  0xa1   :  { %v445_v8 = vadd.f32 %v444_v63, %v443_v59  ;;  %v451_v9 = vadd.f32 %v450_v0, %v449_v60  ;;  %v458_v10 = vrot.slane %v457_v6, 2  ;;  %v464_v11 = vrot.slane %v463_v7, 2  ;;  %v513_v59 = vld [vmem:[#allocation2 + $0x1a8] sm:$0xff] }
  0xa2   :  { %v539_v63 = vld [vmem:[#allocation2 + $0x1c8] sm:$0xff] }
  0xa3   :  { %v446_v12 = vrot.slane %v445_v8, 1  ;;  %v452_v42 = vrot.slane %v451_v9, 1  ;;  %v459_v13 = vadd.f32 %v458_v10, %v457_v6  ;;  %v465_v43 = vadd.f32 %v464_v11, %v463_v7 }
  0xa5   :  { %v447_v14 = vadd.f32 %v446_v12, %v445_v8  ;;  %v453_v15 = vadd.f32 %v452_v42, %v451_v9  ;;  %v460_v16 = vrot.slane %v459_v13, 1  ;;  %v466_v17 = vrot.slane %v465_v43, 1 }
  0xa7   :  { %v461_v18 = vadd.f32 %v460_v16, %v459_v13  ;;  %v467_v19 = vadd.f32 %v466_v17, %v465_v43  ;;  %v468_v20 = vmul.f32 0.125, %v447_v14  ;;  %v469_v21 = vmul.f32 0.125, %v453_v15  ;;  %v551_v13 = vld [vmem:[#allocation2 + $0x1d0] sm:$0xff]  ;;  %v552_v43 = vld [vmem:[#allocation2 + $0x1d8] sm:$0xff] }
  0xa9   :  { %v470_v23 = vmul.f32 0.125, %v461_v18  ;;  %v471_v24 = vmul.f32 0.125, %v467_v19  ;;  %v472_v30 = vmul.f32 %v468_v20, %v468_v20  ;;  %v473_v31 = vmul.f32 %v469_v21, %v469_v21  ;;  %v564_v18 = vld [vmem:[#allocation2 + $0x1e0] sm:$0xff]  ;;  %v565_v19 = vld [vmem:[#allocation2 + $0x1e8] sm:$0xff] }
  0xaa   :  { %v478_v38 = vsub.f32 %v440_v53, %v468_v20  ;;  %v479_v39 = vsub.f32 %v441_v54, %v469_v21  ;;  %v538_v53 = vld [vmem:[#allocation2 + $0x1c0] sm:$0xff]  ;;  %v577_v20 = vld [vmem:[#allocation2 + $0x1f0] sm:$0xff]  ;;  %v578_v21 = vld [vmem:[#allocation2 + $0x1f8] sm:$0xff] }
  0xab   :  { %v474_v32 = vsub.f32 %v470_v23, %v472_v30  ;;  %v475_v22 = vsub.f32 %v471_v24, %v473_v31  ;;  %v590_v23 = vld [vmem:[#allocation2 + $0x200] sm:$0xff]  ;;  %v591_v24 = vld [vmem:[#allocation2 + $0x208] sm:$0xff] }
  0xad   :  { %v476_v35 = vmax.f32 %v474_v32, 0.0  ;;  %v477_v29 = vmax.f32 %v475_v22, 0.0 }
  0xaf   :  { %v480_v36 = vadd.f32 1e-05, %v476_v35  ;;  %v481_v37 = vadd.f32 1e-05, %v477_v29 }
  0xb1   :  { %650 = vrsqrt.f32 %v480_v36 }
  0xb2   :  { %652 = vrsqrt.f32 %v481_v37 }
  0xbb   :  { %v651_v41 = vpop.eup %650 }
  0xbc   :  { %v653_v45 = vpop.eup %652  ;;  %v484_v46 = vmul.f32 %v651_v41, %v478_v38 }
  0xbd   :  { %v485_v40 = vmul.f32 %v653_v45, %v479_v39 }
  0xbe   :  { %v489_v1 = vmul.f32 %v487_v44, %v484_v46 }
  0xbf   :  { %v490_v27 = vmul.f32 %v488_v47, %v485_v40 }
  0xc0   :  { %v494_v50 = vadd.f32 %v492_v48, %v489_v1 }
  0xc1   :  { %v495_v51 = vadd.f32 %v493_v49, %v490_v27 }
  0xc2   :  { %v496_v28 = vmax.f32 %v494_v50, 0.0  ;;  %v603_v50 = vld [vmem:[#allocation2 + $0x210] sm:$0xff] }
  0xc3   :  { %v497_v56 = vmax.f32 %v495_v51, 0.0  ;;  %v604_v51 = vld [vmem:[#allocation2 + $0x218] sm:$0xff] }
  0xc4   :  { %v504_v54 = vrot.slane %v496_v28, %v736_v2  ;;  %v517_v60 = vrot.slane %v496_v28, %v742_v4  ;;  %v530_v62 = vrot.slane %v496_v28, %v739_v3  ;;  %v543_v0 = vrot.slane %v496_v28, %v745_v5 }
  0xc5   :  { %v508_v6 = vrot.slane %v497_v56, %v736_v2  ;;  %v521_v7 = vrot.slane %v497_v56, %v742_v4  ;;  %v534_v8 = vrot.slane %v497_v56, %v739_v3  ;;  %v547_v9 = vrot.slane %v497_v56, %v745_v5 }
  0xc6   :  { %v509_v10 = vmul.f32 %v504_v54, %v499_v52  ;;  %v522_v11 = vmul.f32 %v517_v60, %v512_v57  ;;  %v535_v12 = vmul.f32 %v530_v62, %v525_v58  ;;  %v548_v42 = vmul.f32 %v543_v0, %v538_v53 }
  0xc7   :  { %v510_v14 = vmul.f32 %v508_v6, %v500_v55  ;;  %v523_v15 = vmul.f32 %v521_v7, %v513_v59  ;;  %v536_v16 = vmul.f32 %v534_v8, %v526_v61  ;;  %v549_v17 = vmul.f32 %v547_v9, %v539_v63 }
  0xc8   :  { %v556_v2 = vrot.slane %v496_v28, %v773_v25  ;;  %v560_v4 = vrot.slane %v497_v56, %v773_v25  ;;  %v569_v3 = vrot.slane %v496_v28, %v776_v26  ;;  %v573_v5 = vrot.slane %v497_v56, %v776_v26 }
  0xc9   :  { %v582_v30 = vrot.slane %v496_v28, %v779_v33  ;;  %v586_v31 = vrot.slane %v497_v56, %v779_v33  ;;  %v595_v32 = vrot.slane %v496_v28, %v782_v34  ;;  %v599_v22 = vrot.slane %v497_v56, %v782_v34 }
  0xca   :  { %v561_v35 = vmul.f32 %v556_v2, %v551_v13  ;;  %v562_v29 = vmul.f32 %v560_v4, %v552_v43  ;;  %v574_v36 = vmul.f32 %v569_v3, %v564_v18  ;;  %v575_v37 = vmul.f32 %v573_v5, %v565_v19 }
  0xcb   :  { %v587_v25 = vmul.f32 %v582_v30, %v577_v20  ;;  %v588_v38 = vmul.f32 %v586_v31, %v578_v21  ;;  %v600_v39 = vmul.f32 %v595_v32, %v590_v23  ;;  %v601_v41 = vmul.f32 %v599_v22, %v591_v24 }
  0xcc   :  { %v605_v26 = vadd.f32 %v522_v11, %v509_v10  ;;  %v606_v44 = vadd.f32 %v523_v15, %v510_v14  ;;  %v607_v45 = vadd.f32 %v548_v42, %v535_v12  ;;  %v608_v46 = vadd.f32 %v549_v17, %v536_v16 }
  0xcd   :  { %v609_v47 = vadd.f32 %v574_v36, %v561_v35  ;;  %v610_v40 = vadd.f32 %v575_v37, %v562_v29  ;;  %v611_v48 = vadd.f32 %v600_v39, %v587_v25  ;;  %v612_v33 = vadd.f32 %v601_v41, %v588_v38 }
  0xce   :  { %v613_v1 = vadd.f32 %v607_v45, %v605_v26  ;;  %v614_v49 = vadd.f32 %v608_v46, %v606_v44 }
  0xcf   :  { %v615_v27 = vadd.f32 %v611_v48, %v609_v47  ;;  %v616_v34 = vadd.f32 %v612_v33, %v610_v40 }
  0xd1   :  { %v617_v28 = vadd.f32 %v615_v27, %v613_v1  ;;  %v618_v52 = vadd.f32 %v616_v34, %v614_v49 }
  0xd3   :  { %v619_v55 = vadd.f32 %v617_v28, %v603_v50  ;;  %v620_v56 = vadd.f32 %v618_v52, %v604_v51 }
  0xd5   :  { %621 = vst [vmem:[#allocation5] sm:$0xff] %v619_v55  ;;  %622 = vst [vmem:[#allocation5 + $0x8] sm:$0xff] %v620_v56 }
  0xd6   :  { %687 = shalt.err (!%p684_p12)
}
  0xd7   :  { %s688_s28 = scalar_lea.hbm %s864_s2, 256 }
  0xd8   :  { %p689_p13 = scmp.ne.s32.totalorder %s864_s2, %s688_s28  ;;  %p692_p0 = scmp.lt.u32.totalorder %s688_s28, %s864_s2 }
  0xda   :  { %p694_p1 = pnand %p692_p0, %p689_p13 }
  0xdc   :  { %697 = shalt.err (!%p694_p1)
}
  0xdd   :  { %632 = dma.vmem_to_hbm [thread:$0]  %s630_s1, 256, %s864_s2, [#allocation4]  }
  0xde   :  { %700 = dma.done.wait [#allocation4], 256  }
  0xdf   :  { %701 = vsyncadd [#allocation4], 4294967040 }
  0xe0   :  { %636 = vsyncpa [#allocation3], 1 }
  0xe1   :  { %637 = vsyncpa [#allocation4], 1 }

</bundles_post_ra>
